<compile_context>
chip_gen: v7x
topology: tpu7x:2x2x1
jax: 0.10.0
libtpu: 0.0.40
codegen_flags: <defaults>
</compile_context>

<pallas_src>
import jax
import jax.numpy as jnp
from jax.experimental import pallas as pl
from jax.experimental.pallas import tpu as pltpu

C_FF, C_FB, C_PRE, C_STATE, C_POST = 8, 8, 16, 16, 8
MAX_TM = 8192  # max pixels (lanes) per grid step (~<12 MiB VMEM footprint)


def _pick_tm(hw, batch):
    """Pick a lane tile size (pixels per grid step)."""
    limit = MAX_TM
    if batch < 2 and hw > 256:
        # Keep >= 2 lane tiles so both v7x TensorCores get work when the
        # batch axis alone cannot provide 2 parallel grid steps.
        limit = min(limit, max(128, (hw // 2) // 128 * 128))
    if hw <= limit:
        return hw  # whole plane; full-extent last dim is always a legal block
    # Largest 128-multiple divisor of hw that fits the limit (exact tiling).
    for t in range(limit - limit % 128, 127, -128):
        if hw % t == 0:
            return t
    # No exact divisor: ragged last tile handled by a cdiv grid (Pallas masks).
    return limit - limit % 128


def _rgc_kernel(ff_ref, fb_ref, state_ref,
                w_big_ref, b_big_ref, w_gcp_ref, w_post_ref, b_post_ref,
                out_ref, new_state_ref):
    # Activations: (C, TM) -- channels on sublanes, pixels on lanes.
    ff = ff_ref[...]          # (C_FF,    TM) f32
    fb = fb_ref[...]          # (C_FB,    TM) f32
    state = state_ref[...]    # (C_STATE, TM) f32

    # --- Fused MXU pass #1: everything that does not depend on `pre`. ---
    # x_cat rows: [ff(8) | fb(8) | state(16)]  -> K = 32 (8-aligned concat).
    x_cat = jnp.concatenate([ff, fb, state], axis=0).astype(jnp.bfloat16)
    big = (jnp.dot(w_big_ref[...], x_cat, preferred_element_type=jnp.float32)
           + b_big_ref[...])                                   # (64, TM) f32
    # big rows: [pre_lin(16) | res(16) | g_lin(16) | c_lin(16)]
    pre = jnp.maximum(big[0:C_PRE], 0.0)                       # (C_PRE, TM)
    res = big[C_PRE:C_PRE + C_STATE]                           # (C_STATE, TM)
    g_lin = big[C_PRE + C_STATE:C_PRE + 2 * C_STATE]
    c_lin = big[C_PRE + 2 * C_STATE:]

    # --- Fused MXU pass #2: gate / candidate contributions from `pre`. ---
    gc = jnp.dot(w_gcp_ref[...], pre.astype(jnp.bfloat16),
                 preferred_element_type=jnp.float32)           # (2*C_STATE, TM)
    g = jax.nn.sigmoid(g_lin + gc[:C_STATE])
    c = jnp.tanh(c_lin + gc[C_STATE:])

    new_state = g * state + (1.0 - g) * c
    rec = jnp.maximum(new_state + res, 0.0)                    # (C_STATE, TM)

    # --- MXU pass #3: post-memory 1x1 conv + bias + residual (harbor ff). ---
    out = (jnp.dot(w_post_ref[...], rec.astype(jnp.bfloat16),
                   preferred_element_type=jnp.float32)
           + b_post_ref[...] + ff)                             # (C_POST, TM)

    out_ref[...] = out
    new_state_ref[...] = new_state


def pack_params(p):
    """One-time packing of the 12 PyTorch-style parameters into 5 slabs.

    Call once when parameters are built; the per-timestep forward then reuses
    the packed slabs (no per-call concat/transpose XLA ops).
    """
    f32 = jnp.float32
    z = lambda r, c: jnp.zeros((r, c), f32)
    # Block-structured weight for the fused [ff | fb | state] matmul.
    w_big = jnp.concatenate([
        jnp.concatenate([p["w_pre"].T, z(C_PRE, C_FB), z(C_PRE, C_STATE)], 1),
        jnp.concatenate([p["w_res"].T, z(C_STATE, C_FB), z(C_STATE, C_STATE)], 1),
        jnp.concatenate([z(C_STATE, C_FF), p["w_g_fb"].T, p["w_g_h"].T], 1),
        jnp.concatenate([z(C_STATE, C_FF), z(C_STATE, C_FB), p["w_c_h"].T], 1),
    ], axis=0).astype(jnp.bfloat16)                             # (64, 32)
    b_big = jnp.concatenate([p["b_pre"], jnp.zeros((1, C_STATE), f32),
                             p["b_g"], p["b_c"]], axis=1).T     # (64, 1) f32
    w_gcp = jnp.concatenate([p["w_g_in"], p["w_c_in"]],
                            axis=1).T.astype(jnp.bfloat16)      # (32, 16)
    w_post = p["w_post"].T.astype(jnp.bfloat16)                 # (8, 16)
    b_post = p["b_post"].T                                      # (8, 1) f32
    return {"w_big": w_big, "b_big": b_big, "w_gcp": w_gcp,
            "w_post": w_post, "b_post": b_post}


def recurrent_module_rgc(ff_nchw, fb_nchw, state_nchw, packed):
    """One forward step of RecurrentModuleRGC. Inputs/outputs NCHW float32."""
    B, _, H, W = ff_nchw.shape
    HW = H * W
    TM = _pick_tm(HW, B)
    n_tiles = pl.cdiv(HW, TM)

    # NCHW -> (B, C, H*W): contiguous reshape, no transpose, no HBM round trip.
    ff = ff_nchw.reshape(B, C_FF, HW)
    fb = fb_nchw.reshape(B, C_FB, HW)
    state = state_nchw.reshape(B, C_STATE, HW)

    weights = [packed["w_big"], packed["b_big"], packed["w_gcp"],
               packed["w_post"], packed["b_post"]]

    act_spec = lambda c: pl.BlockSpec((None, c, TM), lambda b, i: (b, 0, i))
    full_spec = lambda w: pl.BlockSpec(w.shape, lambda b, i: (0, 0))

    in_specs = ([act_spec(C_FF), act_spec(C_FB), act_spec(C_STATE)]
                + [full_spec(w) for w in weights])
    out_specs = (act_spec(C_POST), act_spec(C_STATE))
    out_shape = (jax.ShapeDtypeStruct((B, C_POST, HW), jnp.float32),
                 jax.ShapeDtypeStruct((B, C_STATE, HW), jnp.float32))

    out, new_state = pl.pallas_call(
        _rgc_kernel,
        grid=(B, n_tiles),
        in_specs=in_specs,
        out_specs=out_specs,
        out_shape=out_shape,
        compiler_params=pltpu.CompilerParams(
            dimension_semantics=("parallel", "parallel"),
            vmem_limit_bytes=48 * 1024 * 1024),
    )(ff, fb, state, *weights)

    return (out.reshape(B, C_POST, H, W),
            new_state.reshape(B, C_STATE, H, W))


def _reference(ff_nchw, fb_nchw, state_nchw, p):
    """Pure-JAX f32 reference with identical semantics (sanity check)."""
    B, _, H, W = ff_nchw.shape
    flat = lambda x: jnp.transpose(x, (0, 2, 3, 1)).reshape(B * H * W, x.shape[1])
    ff, fb, st = flat(ff_nchw), flat(fb_nchw), flat(state_nchw)
    pre = jnp.maximum(ff @ p["w_pre"] + p["b_pre"], 0.0)
    g = jax.nn.sigmoid(pre @ p["w_g_in"] + st @ p["w_g_h"]
                       + fb @ p["w_g_fb"] + p["b_g"])
    c = jnp.tanh(pre @ p["w_c_in"] + st @ p["w_c_h"] + p["b_c"])
    ns = g * st + (1.0 - g) * c
    rec = jnp.maximum(ns + ff @ p["w_res"], 0.0)
    out = rec @ p["w_post"] + p["b_post"] + ff
    unflat = lambda x, c_: jnp.transpose(x.reshape(B, H, W, c_), (0, 3, 1, 2))
    return unflat(out, C_POST), unflat(ns, C_STATE)


def _init_params(key):
    ks = jax.random.split(key, 12)
    s = 0.1
    return {
        "w_pre":  s * jax.random.normal(ks[0], (C_FF, C_PRE), jnp.float32),
        "b_pre":  s * jax.random.normal(ks[1], (1, C_PRE), jnp.float32),
        "w_g_in": s * jax.random.normal(ks[2], (C_PRE, C_STATE), jnp.float32),
        "w_g_h":  s * jax.random.normal(ks[3], (C_STATE, C_STATE), jnp.float32),
        "w_g_fb": s * jax.random.normal(ks[4], (C_FB, C_STATE), jnp.float32),
        "b_g":    s * jax.random.normal(ks[5], (1, C_STATE), jnp.float32),
        "w_c_in": s * jax.random.normal(ks[6], (C_PRE, C_STATE), jnp.float32),
        "w_c_h":  s * jax.random.normal(ks[7], (C_STATE, C_STATE), jnp.float32),
        "b_c":    s * jax.random.normal(ks[8], (1, C_STATE), jnp.float32),
        "w_res":  s * jax.random.normal(ks[9], (C_FF, C_STATE), jnp.float32),
        "w_post": s * jax.random.normal(ks[10], (C_STATE, C_POST), jnp.float32),
        "b_post": s * jax.random.normal(ks[11], (1, C_POST), jnp.float32),
    }


if __name__ == "__main__":
    key = jax.random.PRNGKey(0)
    k_ff, k_fb, k_st, k_p = jax.random.split(key, 4)

    B, H, W = 2, 16, 16
    ff = jax.random.normal(k_ff, (B, C_FF, H, W), jnp.float32)     # feed-forward (NCHW)
    fb = jax.random.normal(k_fb, (B, C_FB, H, W), jnp.float32)     # feedback (NCHW)
    state = jax.random.normal(k_st, (B, C_STATE, H, W), jnp.float32)
    params = _init_params(k_p)
    packed = pack_params(params)   # one-time packing (reused every timestep)

    out, new_state = recurrent_module_rgc(ff, fb, state, packed)
    jax.block_until_ready((out, new_state))

    ref_out, ref_state = _reference(ff, fb, state, params)
    assert out.shape == (B, C_POST, H, W) and new_state.shape == (B, C_STATE, H, W)
    assert jnp.allclose(out, ref_out, atol=2e-2, rtol=2e-2)
    assert jnp.allclose(new_state, ref_state, atol=2e-2, rtol=2e-2)

    # TODO(synk): generic harbor spatial-resize policies and >1x1 pre/post-memory
    # conv kernels are not implemented; this instantiation uses concat + 1x1 convs.
    # TODO(synk): for tiny planes (H*W < 128) fold the batch into the lane axis
    # so the output stays lane-dense (current 16x16 case is already >=128 lanes).
    print("KERNEL_OK")
</pallas_src>

<mosaic_0001>
module attributes {stable_mosaic.version = 11 : i64} {
  func.func @_rgc_kernel(%arg0: i32, %arg1: i32, %arg2: memref<1x8x256xf32, #tpu.memory_space<vmem>>, %arg3: memref<1x8x256xf32, #tpu.memory_space<vmem>>, %arg4: memref<1x16x256xf32, #tpu.memory_space<vmem>>, %arg5: memref<64x32xbf16, #tpu.memory_space<vmem>>, %arg6: memref<64x1xf32, #tpu.memory_space<vmem>>, %arg7: memref<32x16xbf16, #tpu.memory_space<vmem>>, %arg8: memref<8x16xbf16, #tpu.memory_space<vmem>>, %arg9: memref<8x1xf32, #tpu.memory_space<vmem>>, %arg10: memref<1x8x256xf32, #tpu.memory_space<vmem>>, %arg11: memref<1x16x256xf32, #tpu.memory_space<vmem>>) attributes {dimension_semantics = [#tpu.dimension_semantics<parallel>, #tpu.dimension_semantics<parallel>], iteration_bounds = array<i64: 2, 1>, scalar_prefetch = 0 : i64, scratch_operands = 0 : i64, tpu.core_type = #tpu.core_type<tc>, window_params = [{transform_indices = @transform_0, window_bounds = array<i64: 1, 8, 256>}, {transform_indices = @transform_1, window_bounds = array<i64: 1, 8, 256>}, {transform_indices = @transform_2, window_bounds = array<i64: 1, 16, 256>}, {pipeline_mode = #tpu.pipeline_mode<synchronous>, transform_indices = @transform_3, window_bounds = array<i64: 64, 32>}, {pipeline_mode = #tpu.pipeline_mode<synchronous>, transform_indices = @transform_4, window_bounds = array<i64: 64, 1>}, {pipeline_mode = #tpu.pipeline_mode<synchronous>, transform_indices = @transform_5, window_bounds = array<i64: 32, 16>}, {pipeline_mode = #tpu.pipeline_mode<synchronous>, transform_indices = @transform_6, window_bounds = array<i64: 8, 16>}, {pipeline_mode = #tpu.pipeline_mode<synchronous>, transform_indices = @transform_7, window_bounds = array<i64: 8, 1>}, {transform_indices = @transform_8, window_bounds = array<i64: 1, 8, 256>}, {transform_indices = @transform_9, window_bounds = array<i64: 1, 16, 256>}]} {
    %c0 = arith.constant 0 : index
    %c0_0 = arith.constant 0 : index
    %c0_1 = arith.constant 0 : index
    %0 = vector.load %arg2[%c0, %c0_0, %c0_1] : memref<1x8x256xf32, #tpu.memory_space<vmem>>, vector<1x8x256xf32>
    %1 = vector.shape_cast %0 : vector<1x8x256xf32> to vector<8x256xf32>
    %c0_2 = arith.constant 0 : index
    %c0_3 = arith.constant 0 : index
    %c0_4 = arith.constant 0 : index
    %2 = vector.load %arg3[%c0_2, %c0_3, %c0_4] : memref<1x8x256xf32, #tpu.memory_space<vmem>>, vector<1x8x256xf32>
    %3 = vector.shape_cast %2 : vector<1x8x256xf32> to vector<8x256xf32>
    %c0_5 = arith.constant 0 : index
    %c0_6 = arith.constant 0 : index
    %c0_7 = arith.constant 0 : index
    %4 = vector.load %arg4[%c0_5, %c0_6, %c0_7] : memref<1x16x256xf32, #tpu.memory_space<vmem>>, vector<1x16x256xf32>
    %5 = vector.shape_cast %4 : vector<1x16x256xf32> to vector<16x256xf32>
    %6 = tpu.concatenate %1, %3, %5 in 0 : vector<8x256xf32>, vector<8x256xf32>, vector<16x256xf32> -> vector<32x256xf32>
    %7 = arith.truncf %6 : vector<32x256xf32> to vector<32x256xbf16>
    %c0_8 = arith.constant 0 : index
    %c0_9 = arith.constant 0 : index
    %8 = vector.load %arg5[%c0_8, %c0_9] : memref<64x32xbf16, #tpu.memory_space<vmem>>, vector<64x32xbf16>
    %cst = arith.constant dense<0.000000e+00> : vector<64x256xf32>
    %9 = tpu.matmul %8, %7, %cst {dimension_numbers = #tpu.dot_dimension_numbers<[1], [0], [0], [1], [0, 0, 1, 1], [], []>} : vector<64x32xbf16>, vector<32x256xbf16>, vector<64x256xf32> -> vector<64x256xf32>
    %c0_10 = arith.constant 0 : index
    %c0_11 = arith.constant 0 : index
    %10 = vector.load %arg6[%c0_10, %c0_11] : memref<64x1xf32, #tpu.memory_space<vmem>>, vector<64x1xf32>
    %11 = vector.broadcast %10 : vector<64x1xf32> to vector<64x256xf32>
    %12 = arith.addf %9, %11 : vector<64x256xf32>
    %13 = vector.extract_strided_slice %12 {offsets = [0, 0], sizes = [16, 256], strides = [1, 1]} : vector<64x256xf32> to vector<16x256xf32>
    %cst_12 = arith.constant 0.000000e+00 : f32
    %14 = vector.broadcast %cst_12 : f32 to vector<16x256xf32>
    %15 = arith.maximumf %13, %14 : vector<16x256xf32>
    %16 = vector.extract_strided_slice %12 {offsets = [16, 0], sizes = [16, 256], strides = [1, 1]} : vector<64x256xf32> to vector<16x256xf32>
    %17 = vector.extract_strided_slice %12 {offsets = [32, 0], sizes = [16, 256], strides = [1, 1]} : vector<64x256xf32> to vector<16x256xf32>
    %18 = vector.extract_strided_slice %12 {offsets = [48, 0], sizes = [16, 256], strides = [1, 1]} : vector<64x256xf32> to vector<16x256xf32>
    %c0_13 = arith.constant 0 : index
    %c0_14 = arith.constant 0 : index
    %19 = vector.load %arg7[%c0_13, %c0_14] : memref<32x16xbf16, #tpu.memory_space<vmem>>, vector<32x16xbf16>
    %20 = arith.truncf %15 : vector<16x256xf32> to vector<16x256xbf16>
    %cst_15 = arith.constant dense<0.000000e+00> : vector<32x256xf32>
    %21 = tpu.matmul %19, %20, %cst_15 {dimension_numbers = #tpu.dot_dimension_numbers<[1], [0], [0], [1], [0, 0, 1, 1], [], []>} : vector<32x16xbf16>, vector<16x256xbf16>, vector<32x256xf32> -> vector<32x256xf32>
    %22 = vector.extract_strided_slice %21 {offsets = [0, 0], sizes = [16, 256], strides = [1, 1]} : vector<32x256xf32> to vector<16x256xf32>
    %23 = arith.addf %17, %22 : vector<16x256xf32>
    %24 = arith.negf %23 : vector<16x256xf32>
    %25 = math.exp %24 : vector<16x256xf32>
    %cst_16 = arith.constant 1.000000e+00 : f32
    %26 = vector.broadcast %cst_16 : f32 to vector<16x256xf32>
    %27 = arith.addf %26, %25 : vector<16x256xf32>
    %28 = arith.divf %26, %27 : vector<16x256xf32>
    %29 = vector.extract_strided_slice %21 {offsets = [16, 0], sizes = [16, 256], strides = [1, 1]} : vector<32x256xf32> to vector<16x256xf32>
    %30 = arith.addf %18, %29 : vector<16x256xf32>
    %31 = math.tanh %30 : vector<16x256xf32>
    %32 = arith.mulf %28, %5 : vector<16x256xf32>
    %cst_17 = arith.constant 1.000000e+00 : f32
    %33 = vector.broadcast %cst_17 : f32 to vector<16x256xf32>
    %34 = arith.subf %33, %28 : vector<16x256xf32>
    %35 = arith.mulf %34, %31 : vector<16x256xf32>
    %36 = arith.addf %32, %35 : vector<16x256xf32>
    %37 = arith.addf %36, %16 : vector<16x256xf32>
    %cst_18 = arith.constant 0.000000e+00 : f32
    %38 = vector.broadcast %cst_18 : f32 to vector<16x256xf32>
    %39 = arith.maximumf %37, %38 : vector<16x256xf32>
    %c0_19 = arith.constant 0 : index
    %c0_20 = arith.constant 0 : index
    %40 = vector.load %arg8[%c0_19, %c0_20] : memref<8x16xbf16, #tpu.memory_space<vmem>>, vector<8x16xbf16>
    %41 = arith.truncf %39 : vector<16x256xf32> to vector<16x256xbf16>
    %cst_21 = arith.constant dense<0.000000e+00> : vector<8x256xf32>
    %42 = tpu.matmul %40, %41, %cst_21 {dimension_numbers = #tpu.dot_dimension_numbers<[1], [0], [0], [1], [0, 0, 1, 1], [], []>} : vector<8x16xbf16>, vector<16x256xbf16>, vector<8x256xf32> -> vector<8x256xf32>
    %c0_22 = arith.constant 0 : index
    %c0_23 = arith.constant 0 : index
    %43 = vector.load %arg9[%c0_22, %c0_23] : memref<8x1xf32, #tpu.memory_space<vmem>>, vector<8x1xf32>
    %44 = vector.broadcast %43 : vector<8x1xf32> to vector<8x256xf32>
    %45 = arith.addf %42, %44 : vector<8x256xf32>
    %46 = arith.addf %45, %1 : vector<8x256xf32>
    %c0_24 = arith.constant 0 : index
    %c0_25 = arith.constant 0 : index
    %c0_26 = arith.constant 0 : index
    %47 = vector.load %arg10[%c0_24, %c0_25, %c0_26] : memref<1x8x256xf32, #tpu.memory_space<vmem>>, vector<1x8x256xf32>
    %48 = vector.shape_cast %47 : vector<1x8x256xf32> to vector<8x256xf32>
    %49 = vector.shape_cast %46 : vector<8x256xf32> to vector<1x8x256xf32>
    tpu.vector_store %arg10[%c0_24, %c0_25, %c0_26], %49 {strides = array<i32>} : memref<1x8x256xf32, #tpu.memory_space<vmem>>, vector<1x8x256xf32>,
    %c0_27 = arith.constant 0 : index
    %c0_28 = arith.constant 0 : index
    %c0_29 = arith.constant 0 : index
    %50 = vector.load %arg11[%c0_27, %c0_28, %c0_29] : memref<1x16x256xf32, #tpu.memory_space<vmem>>, vector<1x16x256xf32>
    %51 = vector.shape_cast %50 : vector<1x16x256xf32> to vector<16x256xf32>
    %52 = vector.shape_cast %36 : vector<16x256xf32> to vector<1x16x256xf32>
    tpu.vector_store %arg11[%c0_27, %c0_28, %c0_29], %52 {strides = array<i32>} : memref<1x16x256xf32, #tpu.memory_space<vmem>>, vector<1x16x256xf32>,
    return
  }
  func.func @transform_0(%arg0: i32, %arg1: i32) -> (i32, i32, i32) {
    %c0_i32 = arith.constant 0 : i32
    %c0_i32_0 = arith.constant 0 : i32
    return %arg0, %c0_i32, %arg1 : i32, i32, i32
  }
  func.func @transform_1(%arg0: i32, %arg1: i32) -> (i32, i32, i32) {
    %c0_i32 = arith.constant 0 : i32
    %c0_i32_0 = arith.constant 0 : i32
    return %arg0, %c0_i32, %arg1 : i32, i32, i32
  }
  func.func @transform_2(%arg0: i32, %arg1: i32) -> (i32, i32, i32) {
    %c0_i32 = arith.constant 0 : i32
    %c0_i32_0 = arith.constant 0 : i32
    return %arg0, %c0_i32, %arg1 : i32, i32, i32
  }
  func.func @transform_3(%arg0: i32, %arg1: i32) -> (i32, i32) {
    %c0_i32 = arith.constant 0 : i32
    %c0_i32_0 = arith.constant 0 : i32
    %c0_i32_1 = arith.constant 0 : i32
    return %c0_i32, %c0_i32_0 : i32, i32
  }
  func.func @transform_4(%arg0: i32, %arg1: i32) -> (i32, i32) {
    %c0_i32 = arith.constant 0 : i32
    %c0_i32_0 = arith.constant 0 : i32
    %c0_i32_1 = arith.constant 0 : i32
    return %c0_i32, %c0_i32_0 : i32, i32
  }
  func.func @transform_5(%arg0: i32, %arg1: i32) -> (i32, i32) {
    %c0_i32 = arith.constant 0 : i32
    %c0_i32_0 = arith.constant 0 : i32
    %c0_i32_1 = arith.constant 0 : i32
    return %c0_i32, %c0_i32_0 : i32, i32
  }
  func.func @transform_6(%arg0: i32, %arg1: i32) -> (i32, i32) {
    %c0_i32 = arith.constant 0 : i32
    %c0_i32_0 = arith.constant 0 : i32
    %c0_i32_1 = arith.constant 0 : i32
    return %c0_i32, %c0_i32_0 : i32, i32
  }
  func.func @transform_7(%arg0: i32, %arg1: i32) -> (i32, i32) {
    %c0_i32 = arith.constant 0 : i32
    %c0_i32_0 = arith.constant 0 : i32
    %c0_i32_1 = arith.constant 0 : i32
    return %c0_i32, %c0_i32_0 : i32, i32
  }
  func.func @transform_8(%arg0: i32, %arg1: i32) -> (i32, i32, i32) {
    %c0_i32 = arith.constant 0 : i32
    %c0_i32_0 = arith.constant 0 : i32
    return %arg0, %c0_i32, %arg1 : i32, i32, i32
  }
  func.func @transform_9(%arg0: i32, %arg1: i32) -> (i32, i32, i32) {
    %c0_i32 = arith.constant 0 : i32
    %c0_i32_0 = arith.constant 0 : i32
    return %arg0, %c0_i32, %arg1 : i32, i32, i32
  }
}

</mosaic_0001>

<bundles_post_ra>
// kernel: tpu_custom_call.1
= control target key start
LH: loop header
LB: loop body
LE: loop exit
PB: predicated region body
PF: predicated region fallthrough
CT: control target
= control target key end

     0   :  { %15 = vsyncpa [#allocation3], 0  ;;  %s1587_s0 = inlined_call_operand.vmem [shape: f32[2,8,256], index: 0, kind: input, shape index: {}]   ;;  %s1588_s1 = inlined_call_operand.vmem [shape: f32[2,8,256], index: 1, kind: input, shape index: {}]   ;;  %s1589_s2 = inlined_call_operand.vmem [shape: f32[2,16,256], index: 2, kind: input, shape index: {}]   ;;  %s1590_s3 = inlined_call_operand.vmem [shape: bf16[64,32], index: 3, kind: input, shape index: {}]   ;;  %s1591_s4 = inlined_call_operand.vmem [shape: f32[64,1], index: 4, kind: input, shape index: {}]   ;;  %s1592_s5 = inlined_call_operand.vmem [shape: bf16[32,16], index: 5, kind: input, shape index: {}]   ;;  %s1593_s6 = inlined_call_operand.vmem [shape: bf16[8,16], index: 6, kind: input, shape index: {}]   ;;  %s1594_s7 = inlined_call_operand.vmem [shape: f32[8,1], index: 7, kind: input, shape index: {}]   ;;  %s1595_s8 = inlined_call_operand.hbm [shape: f32[2,8,256], index: 8, kind: output, shape index: {0}]   ;;  %s1596_s9 = inlined_call_operand.hbm [shape: f32[2,16,256], index: 9, kind: output, shape index: {1}]  }
   0x1   :  { %17 = vsyncpa [#allocation3 + $0x1], 0 }
   0x2   :  { %18 = vsyncpa [#allocation5], 0 }
   0x3   :  { %20 = vsyncpa [#allocation5 + $0x1], 0  ;;  %s1336_s30 = smov 0   ;;  %s1338_s10 = smov 0  }
   0x4   :  { %s1340_s11 = smov 0   ;;  %s1342_s12 = smov 0  }
   0x5   :  { %s1344_s13 = smov 0   ;;  %s1346_s14 = smov 0  }
   0x6 LB: > { %1599 = sst [smem:[#allocation8_spill]] %s1275_s13  ;;  %s1011_s15 = sadd.s32 4294967295, %s1279_s14   ;;  %s1279_s14 = sphi %s1346_s14, %s26_s14   ;;  %s1275_s13 = sphi %s1344_s13, %s1606_s13   ;;  %s1271_s12 = sphi %s1342_s12, %s1605_s12   ;;  %s1267_s11 = sphi %s1340_s11, %s1609_s11   ;;  %s1263_s10 = sphi %s1338_s10, %s1608_s10   ;;  %s1259_s30 = sphi %s1336_s30, %s1607_s30  }
   0x7   : > { %s1012_s16 = sadd.s32 4294967294, %s1279_s14   ;;  %s38_s17 = sadd.s32 1, %s1275_s13 }
   0x8   : > { %s236_s18 = sadd.s32 1, %s1267_s11  ;;  %p40_p0 = scmp.ge.s32.totalorder %s38_s17, 2 }
   0x9   : > { %p246_p1 = scmp.ne.s32.totalorder %s1267_s11, %s1263_s10  ;;  %p247_p2 = scmp.eq.s32.totalorder %s1011_s15, 1 }
   0xa   : > { %p252_p3 = scmp.ne.s32.totalorder %s1263_s10, %s1259_s30  ;;  %s1611_s17 = smov (%p40_p0, %s38_s17), 0 }
   0xb   : > { %1600 = sst [smem:[#allocation9_spill]] %s1611_s17  ;;  %p1376_p4 = por %p247_p2, %p246_p1 }
   0xc   : > { %p253_p5 = scmp.eq.s32.totalorder %s1012_s16, 1  ;;  %s231_s20 = ssub.s32 %s1275_s13, %s1611_s17 }
   0xd   : > { %p1015_p6 = scmp.ge.s32.totalorder %s1279_s14, 1  ;;  %p234_p7 = scmp.eq.s32.totalorder %s231_s20, 0 }
   0xe   : > { %p1383_p8 = por %p253_p5, %p252_p3  ;;  %p353_p9 = scmp.lt.s32.totalorder %s1279_s14, 3 }
   0xf   : > { %s1389_s22 = scalar_select %p234_p7, %s1267_s11, %s236_s18  }
  0x10   : > { %p354_p10 = pnand %p1015_p6, %p353_p9 }
  0x11   : > { %1603 = sst [smem:[#allocation10_spill]] %s1389_s22  ;;  %p417_p11 = scmp.lt.s32.totalorder (!%p354_p10), %s1271_s12, 1  ;;  %v1281_v0 = vmov (!%p354_p10), 0   ;;  %v469_v1 = vld [vmem:[%s1591_s4] sm:$0xff] (!%p354_p10)  ;;  %v470_v9 = vld [vmem:[%s1591_s4 + $0x8] sm:$0xff] (!%p354_p10)  ;;  %v475_v17 = vld [vmem:[%s1591_s4 + $0x30] sm:$0xff] (!%p354_p10) }
  0x12   : > { %357 = sbr.rel (%p354_p10) target bundleno = 756 (0x2f4), region = 52  ;;  %582 = vmatprep.mubr.bf16.mxu0 (!%p354_p10), %v1281_v0  ;;  %592 = vmatprep.mubr.bf16.mxu1 (!%p354_p10), %v1281_v0  ;;  %v1139_v15 = vld [vmem:[%s1590_s3] sm:$0xff] (!%p354_p10)   ;;  %v1140_v16 = vld [vmem:[%s1590_s3 + $0x8] sm:$0xff] (!%p354_p10)   ;;  %vm537_vm0 = vcmask (!%p354_p10), 261120   ;;  %v471_v18 = vld [vmem:[%s1591_s4 + $0x10] sm:$0xff] (!%p354_p10)  ;;  %vm643_vm1 = vcmask (!%p354_p10), 130048  }
  0x13   : > { %1137 = vset.pattern.permute.xlu0 (!%p354_p10), %v1281_v0  ;;  %1138 = vset.pattern.permute.xlu1 (!%p354_p10), %v1281_v0  ;;  %v1141_v19 = vld [vmem:[%s1590_s3 + $0x10] sm:$0xff] (!%p354_p10)   ;;  %v766_v20 = vld [vmem:[%s1594_s7] sm:$0xff] (!%p354_p10)  ;;  %v1142_v21 = vld [vmem:[%s1590_s3 + $0x18] sm:$0xff] (!%p354_p10)   ;;  %s1282_s18 = smov (!%p354_p10), [#allocation4]  }
  0x14   : > { %479 = vperm.xlu0 (!%p354_p10), %1137, %v469_v1   ;;  %v473_v22 = vld [vmem:[%s1591_s4 + $0x20] sm:$0xff] (!%p354_p10)  ;;  %v474_v23 = vld [vmem:[%s1591_s4 + $0x28] sm:$0xff] (!%p354_p10)  ;;  %v476_v24 = vld [vmem:[%s1591_s4 + $0x38] sm:$0xff] (!%p354_p10) }
  0x15   : > { %499 = vperm.xlu1 (!%p354_p10), %1138, %v473_v22   ;;  %v472_v25 = vld [vmem:[%s1591_s4 + $0x18] sm:$0xff] (!%p354_p10)  ;;  %v1143_v49 = vld [vmem:[%s1592_s5] sm:$0xff] (!%p354_p10)   ;;  %v1144_v53 = vld [vmem:[%s1592_s5 + $0x8] sm:$0xff] (!%p354_p10)  }
  0x18   : > { %484 = vperm.xlu0 (!%p354_p10), %1137, %v470_v9  }
  0x19   : > { %s418_s23 = scalar_select %p417_p11, %s1271_s12, 1  ;;  %504 = vperm.xlu1 %1138, %v474_v23  }
  0x1b   : > { %s1049_s24 = sshll.u32 %s418_s23, 4  ;;  %s1051_s25 = sshll.u32 %s418_s23, 5 }
  0x1c   : > { %s424_s15 = scalar_lea.vmem %s1587_s0, %s1049_s24  ;;  %s434_s20 = scalar_lea.vmem %s1588_s1, %s1049_s24  ;;  %509 = vperm.xlu0 %1137, %v475_v17  }
  0x1d   : > { %s444_s22 = scalar_lea.vmem %s1589_s2, %s1051_s25  ;;  %v1409_v2 = vld [vmem:[%s424_s15 + $0x8] sm:$0xff]  ;;  %v1411_v4 = vld [vmem:[%s424_s15] sm:$0xff]  ;;  %514 = vperm.xlu1 %1138, %v476_v24   ;;  %s1485_s23 = sand.u32 1, %s1263_s10  }
  0x1e   : > { %v452_v3 = vld [vmem:[%s434_s20 + $0x8] sm:$0xff]  ;;  %v451_v6 = vld [vmem:[%s434_s20] sm:$0xff]  ;;  %v1416_v8 = vld [vmem:[%s444_s22 + $0x18] sm:$0xff]  ;;  %s1017_s26 = sshll.u32 %s1485_s23, 5  ;;  %s1053_s25 = sshll.u32 %s1271_s12, 9 }
  0x1f   : > { %v458_v5 = vpack.c.bf16 %v452_v3, %v1409_v2  ;;  %v1414_v7 = vld [vmem:[%s444_s22 + $0x8] sm:$0xff]  ;;  %v457_v10 = vpack.c.bf16 %v451_v6, %v1411_v4  ;;  %v1424_v12 = vld [vmem:[%s444_s22] sm:$0xff]  ;;  %v1426_v13 = vld [vmem:[%s444_s22 + $0x10] sm:$0xff]  ;;  %s415_s13 = scalar_lea.vmem [#allocation4], %s1017_s26  ;;  %s1504_s28 = scalar_lea.hbm %s1596_s9, %s1053_s25 }
  0x20   : > { %v460_v11 = vpack.c.bf16 %v1416_v8, %v1414_v7  ;;  %v459_v14 = vpack.c.bf16 %v1426_v13, %v1424_v12  ;;  %489 = vperm.xlu0 %1137, %v471_v18   ;;  %s861_s29 = sshll.u32 %s415_s13, 4  ;;  %s830_s15 = scalar_lea.sflag [#allocation5], %s1485_s23  ;;  %s1506_s29 = int_to_ptr.vmem [resolvable:$true] %s861_s29 }
  0x21   : > { %550 = vmatprep.subr.bf16.mxu0 %v458_v5  ;;  %1054 = vmatprep.subr.bf16.mxu1 %v458_v5  ;;  %s1169_s16 = scalar_lea.vmem %s1506_s29, 512  ;;  %s1173_s20 = sshll.u32 %s1282_s18, 4  ;;  %s1174_s20 = int_to_ptr.vmem [resolvable:$false] %s1173_s20 }
  0x22   : > { %551 = vmatpush1.bf16.msra.mxu0 %v457_v10  ;;  %1056 = vmatpush1.bf16.msra.mxu1 %v457_v10  ;;  %p1170_p12 = scmp.ne.s32.totalorder %s1506_s29, %s1169_s16  ;;  %s1175_s26 = scalar_lea.vmem %s1174_s20, 1024 }
  0x23   : > { %552 = vmatprep.subr.bf16.mxu0 %v460_v11  ;;  %1055 = vmatprep.subr.bf16.mxu1 %v460_v11  ;;  %p1176_p1 = scmp.lt.s32.totalorder %s1506_s29, %s1174_s20  ;;  %p1177_p2 = scmp.lt.s32.totalorder %s1175_s26, %s1169_s16 }
  0x24   : > { %769 = vperm.xlu0 %1137, %v766_v20   ;;  %494 = vperm.xlu1 %1138, %v472_v25   ;;  %p1171_p13 = pnand %p1170_p12, %p1376_p4 }
  0x25   : > { %p1178_p3 = por %p1177_p2, %p1176_p1 }
  0x26   : > { %553 = vmatpush1.bf16.msra.mxu0 %v459_v14  ;;  %1057 = vmatpush1.bf16.msra.mxu1 %v459_v14  ;;  %p1172_p0 = pneg %p1171_p13 }
  0x28   : > { %p1179_p5 = pnand %p1178_p3, %p1172_p0 }
  0x29   : > { %1028 = vmatmul.mubr.msk.bf16.vlgmr.msra.gmra.mrb[0].mxu0 %vm537_vm0, %v1139_v15  ;;  %1029 = vmatmul.mubr.msk.bf16.vlgmr.msra.gmra.mrb[0].mxu1 %vm537_vm0, %v1140_v16 }
  0x2a   : > { %602 = vmatprep.mubr.bf16.mxu1 %v1281_v0  ;;  %682 = vmatprep.mubr.bf16.mxu0 %v1281_v0 }
  0x31   : > { %1030 = vmatmul.mubr.msk.bf16.gmra.mrb[4].mxu1 %vm537_vm0, %v1141_v19 }
  0x32   : > { %612 = vmatprep.mubr.bf16.mxu1 %v1281_v0 }
  0x39   : > { %1031 = vmatmul.mubr.msk.bf16.gmra.mrb[8].mxu1 %vm537_vm0, %v1142_v21 }
  0x3a   : > { %807 = vmatprep.mubr.bf16.mxu1 %v1281_v0 }
  0x93   : > { %v480_v26 = vpop.permute.xlu0 %479 }
  0x94   : > { %v500_v56 = vpop.permute.xlu1 %499 }
  0x97   : > { %v485_v27 = vpop.permute.xlu0 %484 }
  0x98   : > { %v505_v59 = vpop.permute.xlu1 %504 }
  0x9b   : > { %v510_v15 = vpop.permute.xlu0 %509 }
  0x9c   : > { %v515_v19 = vpop.permute.xlu1 %514 }
  0xfc   : > { %v584_v28 = vpop.f32.mrb[0].mxu0  ;;  %v1467_v29 = vpop.f32.mrb[0].mxu1 }
  0xfd   : > { %v585_v30 = vadd.f32 %v584_v28, %v480_v26  ;;  %v586_v31 = vpop.f32.mrb[1].mxu0  ;;  %v1469_v32 = vpop.f32.mrb[1].mxu1 }
  0xfe   : > { %v587_v33 = vadd.f32 %v586_v31, %v480_v26  ;;  %v588_v34 = vpop.f32.mrb[2].mxu0  ;;  %v1471_v35 = vpop.f32.mrb[2].mxu1 }
  0xff   : > { %v589_v36 = vadd.f32 %v588_v34, %v485_v27  ;;  %v590_v37 = vpop.f32.mrb[3].mxu0  ;;  %v1473_v38 = vpop.f32.mrb[3].mxu1  ;;  %v623_v40 = vmax.f32 %v585_v30, 0.0 }
 0x100   : > { %v591_v39 = vadd.f32 %v590_v37, %v485_v27  ;;  %v624_v42 = vmax.f32 %v587_v33, 0.0 }
 0x101   : > { %v625_v41 = vmax.f32 %v589_v36, 0.0 }
 0x102   : > { %v626_v43 = vmax.f32 %v591_v39, 0.0 }
 0x103   : > { %v631_v44 = vpack.c.bf16 %v625_v41, %v623_v40 }
 0x104   : > { %v632_v45 = vpack.c.bf16 %v626_v43, %v624_v42  ;;  %v604_v46 = vpop.f32.mrb[4].mxu1 }
 0x105   : > { %v606_v47 = vpop.f32.mrb[5].mxu1  ;;  %v605_v57 = vadd.f32 %v604_v46, %v500_v56 }
 0x106   : > { %650 = vmatprep.subr.bf16.mxu0 %v632_v45  ;;  %v608_v48 = vpop.f32.mrb[6].mxu1  ;;  %v607_v58 = vadd.f32 %v606_v47, %v500_v56 }
 0x107   : > { %651 = vmatpush1.bf16.msra.mxu0 %v631_v44  ;;  %v610_v50 = vpop.f32.mrb[7].mxu1  ;;  %v609_v61 = vadd.f32 %v608_v48, %v505_v59 }
 0x108   : > { %v611_v1 = vadd.f32 %v610_v50, %v505_v59 }
 0x10a   : > { %1034 = vmatmul.mubr.msk.bf16.vlgmr.msra.gmra.mrb[4].mxu0 %vm643_vm1, %v1143_v49 }
 0x10b   : > { %692 = vmatprep.mubr.bf16.mxu0 %v1281_v0 }
 0x10c   : > { %v614_v51 = vpop.f32.mrb[8].mxu1 }
 0x10d   : > { %v616_v52 = vpop.f32.mrb[9].mxu1  ;;  %v615_v17 = vadd.f32 %v614_v51, %v510_v15 }
 0x10e   : > { %v618_v54 = vpop.f32.mrb[10].mxu1  ;;  %v617_v18 = vadd.f32 %v616_v52, %v510_v15 }
 0x10f   : > { %v620_v55 = vpop.f32.mrb[11].mxu1  ;;  %v619_v21 = vadd.f32 %v618_v54, %v515_v19  ;;  %v490_v54 = vpop.permute.xlu0 %489 }
 0x110   : > { %v621_v24 = vadd.f32 %v620_v55, %v515_v19  ;;  %v495_v55 = vpop.permute.xlu1 %494 }
 0x112   : > { %1035 = vmatmul.mubr.msk.bf16.gmra.mrb[8].mxu0 %vm643_vm1, %v1144_v53 }
 0x1dd   : > { %v684_v60 = vpop.f32.mrb[4].mxu0 }
 0x1de   : > { %v703_v62 = vadd.f32 %v684_v60, %v605_v57  ;;  %v686_v63 = vpop.f32.mrb[5].mxu0  ;;  %v595_v60 = vadd.f32 %v1467_v29, %v490_v54 }
 0x1df   : > { %v704_v0 = vadd.f32 %v686_v63, %v607_v58  ;;  %v688_v3 = vpop.f32.mrb[6].mxu0 }
 0x1e0   : > { %v1036_v5 = vmul.f32 -1.442695, %v703_v62  ;;  %v705_v6 = vadd.f32 %v688_v3, %v609_v61  ;;  %v690_v9 = vpop.f32.mrb[7].mxu0 }
 0x1e1   : > { %v1037_v10 = vmul.f32 -1.442695, %v704_v0  ;;  %v706_v11 = vadd.f32 %v690_v9, %v611_v1  ;;  %v597_v1 = vadd.f32 %v1469_v32, %v490_v54 }
 0x1e2   : > { %1145 = vpow2.f32 %v1036_v5  ;;  %v1038_v14 = vmul.f32 -1.442695, %v705_v6  ;;  %v599_v5 = vadd.f32 %v1471_v35, %v495_v55 }
 0x1e3   : > { %1147 = vpow2.f32 %v1037_v10  ;;  %v1039_v16 = vmul.f32 -1.442695, %v706_v11 }
 0x1e4   : > { %1149 = vpow2.f32 %v1038_v14 }
 0x1e5   : > { %1151 = vpow2.f32 %v1039_v16  ;;  %v694_v20 = vpop.f32.mrb[8].mxu0 }
 0x1e6   : > { %v731_v22 = vadd.f32 %v694_v20, %v615_v17  ;;  %v696_v23 = vpop.f32.mrb[9].mxu0 }
 0x1e7   : > { %v732_v25 = vadd.f32 %v696_v23, %v617_v18  ;;  %v698_v26 = vpop.f32.mrb[10].mxu0 }
 0x1e8   : > { %v733_v27 = vadd.f32 %v698_v26, %v619_v21  ;;  %v700_v28 = vpop.f32.mrb[11].mxu0  ;;  %1153 = vtanh.f32 %v731_v22 }
 0x1e9   : > { %v734_v30 = vadd.f32 %v700_v28, %v621_v24  ;;  %1155 = vtanh.f32 %v732_v25 }
 0x1ec   : > { %v1146_v31 = vpop.eup %1145 }
 0x1ed   : > { %v1148_v33 = vpop.eup %1147  ;;  %v719_v34 = vadd.f32 1.0, %v1146_v31 }
 0x1ee   : > { %v1150_v36 = vpop.eup %1149  ;;  %v720_v37 = vadd.f32 1.0, %v1148_v33 }
 0x1ef   : > { %v1152_v39 = vpop.eup %1151  ;;  %1157 = vrcp.f32 %v719_v34  ;;  %v721_v40 = vadd.f32 1.0, %v1150_v36 }
 0x1f0   : > { %1159 = vrcp.f32 %v720_v37  ;;  %v722_v41 = vadd.f32 1.0, %v1152_v39 }
 0x1f1   : > { %1161 = vrcp.f32 %v721_v40 }
 0x1f2   : > { %1163 = vrcp.f32 %v722_v41  ;;  %v1154_v42 = vpop.eup %1153 }
 0x1f3   : > { %1165 = vtanh.f32 %v733_v27  ;;  %v1156_v43 = vpop.eup %1155 }
 0x1f4   : > { %1167 = vtanh.f32 %v734_v30 }
 0x1f9   : > { %v1158_v44 = vpop.eup %1157 }
 0x1fa   : > { %v1160_v45 = vpop.eup %1159  ;;  %v743_v46 = vsub.f32 1.0, %v1158_v44  ;;  %v739_v52 = vmul.f32 %v1158_v44, %v1424_v12 }
 0x1fb   : > { %v1162_v47 = vpop.eup %1161  ;;  %v744_v48 = vsub.f32 1.0, %v1160_v45  ;;  %v740_v56 = vmul.f32 %v1160_v45, %v1414_v7  ;;  %v601_v7 = vadd.f32 %v1473_v38, %v495_v55  ;;  %v763_v38 = vld [vmem:[%s1593_s6] sm:$0xf] }
 0x1fc   : > { %v1164_v49 = vpop.eup %1163  ;;  %v747_v50 = vmul.f32 %v1154_v42, %v743_v46  ;;  %v745_v51 = vsub.f32 1.0, %v1162_v47  ;;  %v741_v62 = vmul.f32 %v1162_v47, %v1426_v13 }
 0x1fd   : > { %v1166_v53 = vpop.eup %1165  ;;  %v746_v57 = vsub.f32 1.0, %v1164_v49  ;;  %v748_v58 = vmul.f32 %v1156_v43, %v744_v48  ;;  %v742_v0 = vmul.f32 %v1164_v49, %v1416_v8 }
 0x1fe   : > { %v1168_v59 = vpop.eup %1167  ;;  %v749_v61 = vmul.f32 %v1166_v53, %v745_v51  ;;  %v751_v63 = vadd.f32 %v747_v50, %v739_v52 }
 0x1ff   : > { %v750_v3 = vmul.f32 %v1168_v59, %v746_v57  ;;  %v752_v12 = vadd.f32 %v748_v58, %v740_v56 }
 0x200   : > { %v753_v6 = vadd.f32 %v749_v61, %v741_v62  ;;  %v755_v9 = vadd.f32 %v751_v63, %v595_v60  ;;  %820 = vst [vmem:[%s415_s13] sm:$0xff] %v751_v63 }
 0x201   : > { %v754_v10 = vadd.f32 %v750_v3, %v742_v0  ;;  %v756_v29 = vadd.f32 %v752_v12, %v597_v1  ;;  %821 = vst [vmem:[%s415_s13 + $0x8] sm:$0xff] %v752_v12 }
 0x202   : > { %v757_v13 = vadd.f32 %v753_v6, %v599_v5  ;;  %822 = vst [vmem:[%s415_s13 + $0x10] sm:$0xff] %v753_v6  ;;  %v759_v8 = vmax.f32 %v755_v9, 0.0 }
 0x203   : > { %v758_v11 = vadd.f32 %v754_v10, %v601_v7  ;;  %823 = vst [vmem:[%s415_s13 + $0x18] sm:$0xff] %v754_v10  ;;  %v760_v14 = vmax.f32 %v756_v29, 0.0 }
 0x204   : > { %v761_v32 = vmax.f32 %v757_v13, 0.0 }
 0x205   : > { %v762_v35 = vmax.f32 %v758_v11, 0.0 }
 0x206   : > { %v764_v15 = vpack.c.bf16 %v761_v32, %v759_v8 }
 0x207   : > { %v765_v16 = vpack.c.bf16 %v762_v35, %v760_v14 }
 0x209   : > { %775 = vmatprep.subr.bf16.mxu1 %v765_v16 }
 0x20a   : > { %776 = vmatpush1.bf16.msra.mxu1 %v764_v15 }
 0x20d   : > { %1040 = vmatmul.mubr.msk.bf16.vlgmr.msra.gmra.mrb[12].mxu1 %vm643_vm1, %v763_v38 }
 0x20e   : > { %1182 = shalt.err (!%p1179_p5)
}
 0x20f   : > { %s1183_s13 = scalar_lea.hbm %s1504_s28, 512  ;;  %s1187_s25 = scalar_lea.hbm %s1596_s9, 1024 }
 0x210   : > { %p1184_p6 = scmp.ne.s32.totalorder %s1504_s28, %s1183_s13  ;;  %p1188_p10 = scmp.lt.u32.totalorder %s1504_s28, %s1596_s9 }
 0x211   : > { %p1189_p11 = scmp.lt.u32.totalorder %s1187_s25, %s1183_s13  ;;  %p1191_p13 = scmp.lt.u32.totalorder %s1183_s13, %s1504_s28 }
 0x212   : > { %p1185_p7 = pnand %p1184_p6, %p1376_p4 }
 0x213   : > { %p1190_p12 = por %p1189_p11, %p1188_p10 }
 0x214   : > { %p1186_p9 = pneg %p1185_p7 }
 0x215   : > { %p1192_p0 = por %p1191_p13, %p1190_p12 }
 0x217   : > { %p1193_p1 = pnand %p1192_p0, %p1186_p9 }
 0x219   : > { %1196 = shalt.err (!%p1193_p1)
}
 0x21a   : > { %s1283_s16 = smov 256   ;;  %s1284_s18 = smov 16   ;;  %v770_v17 = vpop.permute.xlu0 %769 }
 0x21b   : > { %1075 = dma.vmem_to_hbm [thread:$0]  (%p1376_p4), %s1506_s29, 512, %s1504_s28, %s830_s15, %s1283_s16, %s1283_s16, %s1284_s18  }
 0x21c   : > { %s1016_s20 = sshll.u32 %s1485_s23, 4  ;;  %s1052_s26 = sshll.u32 %s1271_s12, 8 }
 0x21d   : > { %s408_s13 = scalar_lea.vmem [#allocation2], %s1016_s20  ;;  %s1539_s28 = scalar_lea.hbm %s1595_s8, %s1052_s26 }
 0x21e   : > { %s846_s17 = sshll.u32 %s408_s13, 4  ;;  %s825_s12 = scalar_lea.sflag [#allocation3], %s1485_s23  ;;  %s1541_s17 = int_to_ptr.vmem [resolvable:$true] %s846_s17 }
 0x21f   : > { %s1197_s29 = scalar_lea.vmem %s1541_s17, 256  ;;  %s1285_s15 = smov [#allocation2]  }
 0x220   : > { %p1198_p2 = scmp.ne.s32.totalorder %s1541_s17, %s1197_s29  ;;  %s1201_s22 = sshll.u32 %s1285_s15, 4  ;;  %s1202_s22 = int_to_ptr.vmem [resolvable:$false] %s1201_s22 }
 0x221   : > { %s1203_s27 = scalar_lea.vmem %s1202_s22, 512  ;;  %p1204_p6 = scmp.lt.s32.totalorder %s1541_s17, %s1202_s22 }
 0x222   : > { %p1199_p3 = pnand %p1198_p2, %p1376_p4  ;;  %p1205_p7 = scmp.lt.s32.totalorder %s1203_s27, %s1197_s29 }
 0x224   : > { %p1200_p5 = pneg %p1199_p3  ;;  %p1206_p9 = por %p1205_p7, %p1204_p6 }
 0x226   : > { %p1207_p10 = pnand %p1206_p9, %p1200_p5 }
 0x2e0   : > { %v809_v18 = vpop.f32.mrb[12].mxu1 }
 0x2e1   : > { %v810_v19 = vadd.f32 %v809_v18, %v770_v17  ;;  %v811_v20 = vpop.f32.mrb[13].mxu1 }
 0x2e2   : > { %v812_v21 = vadd.f32 %v811_v20, %v770_v17  ;;  %v813_v22 = vpop.f32.mrb[14].mxu1 }
 0x2e3   : > { %v816_v23 = vadd.f32 %v810_v19, %v1411_v4  ;;  %v814_v24 = vpop.f32.mrb[15].mxu1 }
 0x2e4   : > { %v817_v25 = vadd.f32 %v812_v21, %v1409_v2 }
 0x2e5   : > { %818 = vst [vmem:[%s408_s13] sm:$0xff] %v816_v23 }
 0x2e6   : > { %819 = vst [vmem:[%s408_s13 + $0x8] sm:$0xff] %v817_v25 }
 0x2e7   : > { %1210 = shalt.err (!%p1207_p10)
}
 0x2e8   : > { %s1211_s23 = scalar_lea.hbm %s1539_s28, 256  ;;  %s1215_s20 = scalar_lea.hbm %s1595_s8, 512 }
 0x2e9   : > { %p1212_p11 = scmp.ne.s32.totalorder %s1539_s28, %s1211_s23  ;;  %p1216_p0 = scmp.lt.u32.totalorder %s1539_s28, %s1595_s8 }
 0x2ea   : > { %p1217_p1 = scmp.lt.u32.totalorder %s1215_s20, %s1211_s23  ;;  %p1219_p3 = scmp.lt.u32.totalorder %s1211_s23, %s1539_s28 }
 0x2eb   : > { %p1213_p12 = pnand %p1212_p11, %p1376_p4 }
 0x2ec   : > { %p1218_p2 = por %p1217_p1, %p1216_p0 }
 0x2ed   : > { %p1214_p13 = pneg %p1213_p12 }
 0x2ee   : > { %p1220_p5 = por %p1219_p3, %p1218_p2 }
 0x2f0   : > { %p1221_p6 = pnand %p1220_p5, %p1214_p13 }
 0x2f2   : > { %1224 = shalt.err (!%p1221_p6)
}
 0x2f3   : > { %1074 = dma.vmem_to_hbm [thread:$0]  (%p1376_p4), %s1541_s17, 256, %s1539_s28, %s825_s12  }
 0x2f4 PF: > { %p1085_p7 = scmp.ge.s32.totalorder %s1279_s14, 2  ;;  %s876_s24 = sand.u32 1, %s1259_s30  }
 0x2f5   : > { %s877_s25 = scalar_lea.sflag [#allocation3], %s876_s24 }
 0x2f6   : > { %p1079_p9 = pnand %p1085_p7, %p1383_p8 }
 0x2f8   : > { %1250 = dma.done.wait (!%p1079_p9), %s877_s25, 256  }
 0x2f9   : > { %1252 = vsyncadd (!%p1079_p9), %s877_s25, 4294967040  ;;  %s886_s29 = scalar_lea.sflag [#allocation5], %s876_s24 }
 0x2fa   : > { %1254 = dma.done.wait (!%p1079_p9), %s886_s29, 512  }
 0x2fb   : > { %1256 = vsyncadd (!%p1079_p9), %s886_s29, 4294966784  ;;  %s26_s14 = sadd.s32 1, %s1279_s14   ;;  %s1604_s19 = sld [smem:[#allocation10_spill]] }
 0x2fc   : > { %p23_p10 = scmp.ge.s32.totalorder %s26_s14, 4   ;;  %s1605_s12 = sld [smem:[#allocation8_spill]] }
 0x2fd   : > { %s1606_s13 = sld [smem:[#allocation9_spill]]  ;;  %s1607_s30 = smov %s1263_s10 }
 0x2fe   : > { %s1608_s10 = smov %s1267_s11  ;;  %25 = sbr.rel (!%p23_p10) target bundleno = 6 (0x6), region = 110 }
 0x301   : > { %s1609_s11 = smov %s1604_s19 }
 0x305   :  { %891 = vsyncpa [#allocation3], 1 }
 0x306   :  { %893 = vsyncpa [#allocation3 + $0x1], 1 }
 0x307   :  { %894 = vsyncpa [#allocation5], 1 }
 0x308   :  { %896 = vsyncpa [#allocation5 + $0x1], 1 }

</bundles_post_ra>
